<compile_context>
chip_gen: v5e
topology: v5e:2x2
jax: 0.10.0
libtpu: 0.0.40
codegen_flags: <defaults>
</compile_context>

<pallas_src>
import jax
import jax.numpy as jnp
from jax.experimental import pallas as pl
from jax.experimental.pallas import tpu as pltpu


_LANE = 128      # last-dim vreg lane width
_SUBLANE = 8     # second-to-last dim vreg sublane width (f32)


def _round_up(n, m):
    return ((n + m - 1) // m) * m


def _pad_dim(n):
    # Lane-dense (>=128) padded width for dims fed to the MXU N axis.
    # 128 fully feeds the v5e 128x128 MXU; for dims beyond one column tile
    # prefer multiples of 256 (v6e/v7x MXUs are 2x256x256).
    if n <= _LANE:
        return _LANE
    return _round_up(n, 2 * _LANE)


def _decoder_kernel(x_ref, w1_ref, b1_ref, w2_ref, b2_ref, o_ref):
    # Two bf16 MXU matmuls with f32 accumulation; bias add / ReLU (VPU) and
    # sigmoid (EUP) stay f32 and hide under the matmul slots.
    x = x_ref[...].astype(jnp.bfloat16)                               # (tm, z)
    h = jnp.dot(x, w1_ref[...], preferred_element_type=jnp.float32)   # (tm, h_p)
    h = jnp.maximum(h + b1_ref[...], 0.0)                             # ReLU, f32
    y = jnp.dot(h.astype(jnp.bfloat16), w2_ref[...],
                preferred_element_type=jnp.float32)                   # (tm, o_p)
    o_ref[...] = jax.nn.sigmoid(y + b2_ref[...])


def prepare_decoder_params(w1, b1, w2, b2, *, matmul_dtype=jnp.bfloat16):
    """One-time parameter prep: pad N dims lane-dense, cast matmul weights.

    w1: (z_dim, hidden), b1: (hidden,), w2: (hidden, output), b2: (output,)
    Returns a dict reusable across all decoder_forward calls.
    """
    z_dim, hidden_dim = w1.shape
    output_dim = w2.shape[1]
    h_p = _pad_dim(hidden_dim)
    o_p = _pad_dim(output_dim)

    f32 = jnp.float32
    w1_p = jnp.zeros((z_dim, h_p), matmul_dtype).at[:, :hidden_dim].set(
        w1.astype(matmul_dtype))
    b1_p = jnp.zeros((1, h_p), f32).at[:, :hidden_dim].set(
        b1.reshape(1, -1).astype(f32))
    w2_p = jnp.zeros((h_p, o_p), matmul_dtype).at[:hidden_dim, :output_dim].set(
        w2.astype(matmul_dtype))
    b2_p = jnp.zeros((1, o_p), f32).at[:, :output_dim].set(
        b2.reshape(1, -1).astype(f32))
    return dict(w1=w1_p, b1=b1_p, w2=w2_p, b2=b2_p,
                z_dim=z_dim, output_dim=output_dim)


def decoder_forward(x, params, *, tm=None):
    """x: (B, z_dim); params from prepare_decoder_params; returns (B, output_dim) f32."""
    B, z_dim = x.shape
    w1_p, b1_p, w2_p, b2_p = params["w1"], params["b1"], params["w2"], params["b2"]
    output_dim = params["output_dim"]
    assert params["z_dim"] == z_dim
    o_p = w2_p.shape[1]

    # ---- batch tiling: grid >= 2 whenever B is splittable (v7x megacore),
    #      big MXU-friendly tiles for large B, partial last tile handled by Pallas.
    if tm is None:
        cap = 512 if B >= 1024 else 256
        tm = min(cap, _round_up(pl.cdiv(B, 2), _SUBLANE))
    tm = max(_SUBLANE, _round_up(tm, _SUBLANE))
    grid = (pl.cdiv(B, tm),)

    # ---- explicit VMEM budget: residents + double-buffered in/out tiles + headroom
    resident = sum(int(a.size) * a.dtype.itemsize for a in (w1_p, b1_p, w2_p, b2_p))
    buffers = 2 * tm * z_dim * x.dtype.itemsize + 2 * tm * o_p * 4
    vmem_limit = int(resident + buffers + (4 << 20))
    vmem_limit = min(64 << 20, max(16 << 20, vmem_limit))

    out_p = pl.pallas_call(
        _decoder_kernel,
        out_shape=jax.ShapeDtypeStruct((B, o_p), jnp.float32),
        grid_spec=pltpu.PrefetchScalarGridSpec(
            num_scalar_prefetch=0,
            grid=grid,
            in_specs=[
                # x: pipelined (double-buffered) over batch tiles; last dim is
                # the full z_dim (no wrapper pad).
                pl.BlockSpec((tm, z_dim), lambda i: (i, 0)),
                # weights/biases: untiled, single-copy VMEM residents
                pl.BlockSpec(memory_space=pltpu.MemorySpace.VMEM),  # W1
                pl.BlockSpec(memory_space=pltpu.MemorySpace.VMEM),  # b1
                pl.BlockSpec(memory_space=pltpu.MemorySpace.VMEM),  # W2
                pl.BlockSpec(memory_space=pltpu.MemorySpace.VMEM),  # b2
            ],
            out_specs=pl.BlockSpec((tm, o_p), lambda i: (i, 0)),
        ),
        compiler_params=pltpu.CompilerParams(
            dimension_semantics=("parallel",),
            vmem_limit_bytes=vmem_limit),
    )(x, w1_p, b1_p, w2_p, b2_p)

    # Only the output-column padding (if any) is sliced away; no batch slice.
    if o_p != output_dim:
        out_p = out_p[:, :output_dim]
    return out_p
    # TODO(synk): for hidden/output dims in the multi-thousand range on v7x
    # (64 MiB VMEM), switch W2 to an N-tiled BlockSpec with a second grid axis
    # instead of a full VMEM resident.


# ---------------------------- references -------------------------------------

def _ref_forward_f32(x, w1, b1, w2, b2):
    hi = jax.lax.Precision.HIGHEST
    h = jnp.maximum(jnp.dot(x, w1, precision=hi) + b1.reshape(1, -1), 0.0)
    return jax.nn.sigmoid(jnp.dot(h, w2, precision=hi) + b2.reshape(1, -1))


def _ref_forward_bf16(x, w1, b1, w2, b2):
    # Mirrors the kernel's numerics: bf16 matmul operands, f32 accumulation,
    # f32 bias/ReLU/sigmoid.
    bf = jnp.bfloat16
    h = jnp.dot(x.astype(bf), w1.astype(bf),
                preferred_element_type=jnp.float32) + b1.reshape(1, -1)
    h = jnp.maximum(h, 0.0)
    y = jnp.dot(h.astype(bf), w2.astype(bf),
                preferred_element_type=jnp.float32) + b2.reshape(1, -1)
    return jax.nn.sigmoid(y)


if __name__ == "__main__":
    key = jax.random.PRNGKey(0)
    keys = jax.random.split(key, 11)

    # ---- test 1: small shapes implied by the module (single-shot grid) ----
    B, z_dim, hidden_dim, output_dim = 8, 8, 32, 64
    x = jax.random.normal(keys[0], (B, z_dim), dtype=jnp.float32)
    w1 = jax.random.normal(keys[1], (z_dim, hidden_dim), dtype=jnp.float32) / jnp.sqrt(z_dim)
    b1 = jax.random.normal(keys[2], (hidden_dim,), dtype=jnp.float32) * 0.01
    w2 = jax.random.normal(keys[3], (hidden_dim, output_dim), dtype=jnp.float32) / jnp.sqrt(hidden_dim)
    b2 = jax.random.normal(keys[4], (output_dim,), dtype=jnp.float32) * 0.01

    params = prepare_decoder_params(w1, b1, w2, b2)          # one-time prep
    out = jax.block_until_ready(decoder_forward(x, params))
    assert out.shape == (B, output_dim)
    assert jnp.allclose(out, _ref_forward_bf16(x, w1, b1, w2, b2),
                        atol=2e-3, rtol=2e-3), "mismatch vs bf16 reference (small)"
    assert jnp.allclose(out, _ref_forward_f32(x, w1, b1, w2, b2),
                        atol=5e-2, rtol=5e-2), "mismatch vs f32 reference (small)"

    # ---- test 2: non-divisible batch, non-aligned dims, multi-tile grid ----
    B2, z2, h2, o2 = 300, 20, 200, 136
    x2 = jax.random.normal(keys[5], (B2, z2), dtype=jnp.float32)
    w1b = jax.random.normal(keys[6], (z2, h2), dtype=jnp.float32) / jnp.sqrt(z2)
    b1b = jax.random.normal(keys[7], (h2,), dtype=jnp.float32) * 0.01
    w2b = jax.random.normal(keys[8], (h2, o2), dtype=jnp.float32) / jnp.sqrt(h2)
    b2b = jax.random.normal(keys[9], (o2,), dtype=jnp.float32) * 0.01

    params2 = prepare_decoder_params(w1b, b1b, w2b, b2b)
    out2 = jax.block_until_ready(decoder_forward(x2, params2))
    assert out2.shape == (B2, o2)
    assert jnp.allclose(out2, _ref_forward_bf16(x2, w1b, b1b, w2b, b2b),
                        atol=2e-3, rtol=2e-3), "mismatch vs bf16 reference (tiled)"
    assert jnp.allclose(out2, _ref_forward_f32(x2, w1b, b1b, w2b, b2b),
                        atol=5e-2, rtol=5e-2), "mismatch vs f32 reference (tiled)"

    print("KERNEL_OK")
</pallas_src>

<mosaic_0001>
module attributes {stable_mosaic.version = 11 : i64} {
  func.func @_decoder_kernel(%arg0: i32, %arg1: memref<8x8xf32, #tpu.memory_space<vmem>>, %arg2: memref<8x128xbf16, #tpu.memory_space<vmem>>, %arg3: memref<1x128xf32, #tpu.memory_space<vmem>>, %arg4: memref<128x128xbf16, #tpu.memory_space<vmem>>, %arg5: memref<1x128xf32, #tpu.memory_space<vmem>>, %arg6: memref<8x128xf32, #tpu.memory_space<vmem>>) attributes {dimension_semantics = [#tpu.dimension_semantics<parallel>], iteration_bounds = array<i64: 1>, scalar_prefetch = 0 : i64, scratch_operands = 0 : i64, tpu.core_type = #tpu.core_type<tc>, window_params = [{transform_indices = @transform_0, window_bounds = array<i64: 8, 8>}, {pipeline_mode = #tpu.pipeline_mode<synchronous>, transform_indices = @transform_1, window_bounds = array<i64: 8, 128>}, {pipeline_mode = #tpu.pipeline_mode<synchronous>, transform_indices = @transform_2, window_bounds = array<i64: 1, 128>}, {pipeline_mode = #tpu.pipeline_mode<synchronous>, transform_indices = @transform_3, window_bounds = array<i64: 128, 128>}, {pipeline_mode = #tpu.pipeline_mode<synchronous>, transform_indices = @transform_4, window_bounds = array<i64: 1, 128>}, {transform_indices = @transform_5, window_bounds = array<i64: 8, 128>}]} {
    %c0 = arith.constant 0 : index
    %c0_0 = arith.constant 0 : index
    %0 = vector.load %arg1[%c0, %c0_0] : memref<8x8xf32, #tpu.memory_space<vmem>>, vector<8x8xf32>
    %1 = arith.truncf %0 : vector<8x8xf32> to vector<8x8xbf16>
    %c0_1 = arith.constant 0 : index
    %c0_2 = arith.constant 0 : index
    %2 = vector.load %arg2[%c0_1, %c0_2] : memref<8x128xbf16, #tpu.memory_space<vmem>>, vector<8x128xbf16>
    %cst = arith.constant dense<0.000000e+00> : vector<8x128xf32>
    %3 = tpu.matmul %1, %2, %cst {dimension_numbers = #tpu.dot_dimension_numbers<[1], [0], [0], [1], [0, 0, 1, 1], [], []>} : vector<8x8xbf16>, vector<8x128xbf16>, vector<8x128xf32> -> vector<8x128xf32>
    %c0_3 = arith.constant 0 : index
    %c0_4 = arith.constant 0 : index
    %4 = vector.load %arg3[%c0_3, %c0_4] : memref<1x128xf32, #tpu.memory_space<vmem>>, vector<1x128xf32>
    %5 = vector.broadcast %4 : vector<1x128xf32> to vector<8x128xf32>
    %6 = arith.addf %3, %5 : vector<8x128xf32>
    %cst_5 = arith.constant 0.000000e+00 : f32
    %7 = vector.broadcast %cst_5 : f32 to vector<8x128xf32>
    %8 = arith.maximumf %6, %7 : vector<8x128xf32>
    %9 = arith.truncf %8 : vector<8x128xf32> to vector<8x128xbf16>
    %c0_6 = arith.constant 0 : index
    %c0_7 = arith.constant 0 : index
    %10 = vector.load %arg4[%c0_6, %c0_7] : memref<128x128xbf16, #tpu.memory_space<vmem>>, vector<128x128xbf16>
    %cst_8 = arith.constant dense<0.000000e+00> : vector<8x128xf32>
    %11 = tpu.matmul %9, %10, %cst_8 {dimension_numbers = #tpu.dot_dimension_numbers<[1], [0], [0], [1], [0, 0, 1, 1], [], []>} : vector<8x128xbf16>, vector<128x128xbf16>, vector<8x128xf32> -> vector<8x128xf32>
    %c0_9 = arith.constant 0 : index
    %c0_10 = arith.constant 0 : index
    %12 = vector.load %arg5[%c0_9, %c0_10] : memref<1x128xf32, #tpu.memory_space<vmem>>, vector<1x128xf32>
    %13 = vector.broadcast %12 : vector<1x128xf32> to vector<8x128xf32>
    %14 = arith.addf %11, %13 : vector<8x128xf32>
    %15 = arith.negf %14 : vector<8x128xf32>
    %16 = math.exp %15 : vector<8x128xf32>
    %cst_11 = arith.constant 1.000000e+00 : f32
    %17 = vector.broadcast %cst_11 : f32 to vector<8x128xf32>
    %18 = arith.addf %17, %16 : vector<8x128xf32>
    %19 = arith.divf %17, %18 : vector<8x128xf32>
    %c0_12 = arith.constant 0 : index
    %c0_13 = arith.constant 0 : index
    %20 = vector.load %arg6[%c0_12, %c0_13] : memref<8x128xf32, #tpu.memory_space<vmem>>, vector<8x128xf32>
    tpu.vector_store %arg6[%c0_12, %c0_13], %19 {strides = array<i32>} : memref<8x128xf32, #tpu.memory_space<vmem>>, vector<8x128xf32>,
    return
  }
  func.func @transform_0(%arg0: i32) -> (i32, i32) {
    %c0_i32 = arith.constant 0 : i32
    %c0_i32_0 = arith.constant 0 : i32
    return %arg0, %c0_i32 : i32, i32
  }
  func.func @transform_1(%arg0: i32) -> (i32, i32) {
    %c0_i32 = arith.constant 0 : i32
    %c0_i32_0 = arith.constant 0 : i32
    %c0_i32_1 = arith.constant 0 : i32
    return %c0_i32, %c0_i32_0 : i32, i32
  }
  func.func @transform_2(%arg0: i32) -> (i32, i32) {
    %c0_i32 = arith.constant 0 : i32
    %c0_i32_0 = arith.constant 0 : i32
    %c0_i32_1 = arith.constant 0 : i32
    return %c0_i32, %c0_i32_0 : i32, i32
  }
  func.func @transform_3(%arg0: i32) -> (i32, i32) {
    %c0_i32 = arith.constant 0 : i32
    %c0_i32_0 = arith.constant 0 : i32
    %c0_i32_1 = arith.constant 0 : i32
    return %c0_i32, %c0_i32_0 : i32, i32
  }
  func.func @transform_4(%arg0: i32) -> (i32, i32) {
    %c0_i32 = arith.constant 0 : i32
    %c0_i32_0 = arith.constant 0 : i32
    %c0_i32_1 = arith.constant 0 : i32
    return %c0_i32, %c0_i32_0 : i32, i32
  }
  func.func @transform_5(%arg0: i32) -> (i32, i32) {
    %c0_i32 = arith.constant 0 : i32
    %c0_i32_0 = arith.constant 0 : i32
    return %arg0, %c0_i32 : i32, i32
  }
}

</mosaic_0001>

<bundles_post_ra>
// kernel: tpu_custom_call.1
= control target key start
LH: loop header
LB: loop body
LE: loop exit
PB: predicated region body
PF: predicated region fallthrough
CT: control target
= control target key end

     0   :  { %10 = vsyncpa [#allocation3], 0  ;;  %s424_s0 = inlined_call_operand.hbm [shape: f32[8,8], index: 0, kind: input, shape index: {}]   ;;  %s425_s1 = inlined_call_operand.hbm [shape: bf16[8,128], index: 1, kind: input, shape index: {}]   ;;  %s426_s2 = inlined_call_operand.vmem [shape: f32[1,128], index: 2, kind: input, shape index: {}]   ;;  %s427_s3 = inlined_call_operand.hbm [shape: bf16[128,128], index: 3, kind: input, shape index: {}]   ;;  %s428_s4 = inlined_call_operand.vmem [shape: f32[1,128], index: 4, kind: input, shape index: {}]   ;;  %s429_s5 = inlined_call_operand.hbm [shape: f32[8,128], index: 5, kind: output, shape index: {}]  }
   0x1   :  { %11 = vsyncpa [#allocation6], 0  ;;  %s29_s20 = sshll.u32 %s425_s1, 4  ;;  %s30_s20 = int_to_ptr.hbm [resolvable:$true] %s29_s20 }
   0x2   :  { %12 = vsyncpa [#allocation4], 0  ;;  %s370_s21 = smov [#allocation5]   ;;  %s18_s25 = sshll.u32 %s424_s0, 4  ;;  %s19_s25 = int_to_ptr.hbm [resolvable:$true] %s18_s25 }
   0x3   :  { %s31_s22 = sshll.u32 %s370_s21, 4  ;;  %s371_s26 = smov [#allocation2]   ;;  %s32_s22 = int_to_ptr.vmem [resolvable:$true] %s31_s22 }
   0x4   :  { %34 = dma.hbm_to_vmem [thread:$0]  %s30_s20, 64, %s32_s22, [#allocation6]  }
   0x5   :  { %s20_s27 = sshll.u32 %s371_s26, 4  ;;  %s41_s30 = sshll.u32 %s427_s3, 4  ;;  %s21_s27 = int_to_ptr.vmem [resolvable:$true] %s20_s27  ;;  %s42_s30 = int_to_ptr.hbm [resolvable:$true] %s41_s30 }
   0x6   :  { %23 = dma.hbm_to_vmem [thread:$0]  %s19_s25, 128, %s21_s27, [#allocation3]  }
   0x7   :  { %s372_s1 = smov [#allocation7]   ;;  %s373_s7 = smov 64  }
   0x8   :  { %s43_s6 = sshll.u32 %s372_s1, 4  ;;  %s374_s8 = smov 4   ;;  %s44_s6 = int_to_ptr.vmem [resolvable:$true] %s43_s6 }
   0x9   :  { %49 = dma.hbm_to_vmem [thread:$0]  %s42_s30, 1024, %s44_s6, [#allocation6], %s373_s7, %s373_s7, %s374_s8  }
   0xa   :  { %364 = dma.done.wait [#allocation3], 128  }
   0xb   :  { %365 = vsyncadd [#allocation3], 4294967168 }
   0xc   :  { %366 = dma.done.wait [#allocation6], 1088  }
   0xd   :  { %367 = vsyncadd [#allocation6], 4294966208  ;;  %vm76_vm0 = vcmask 1043456   ;;  %v67_v0 = vld [vmem:[#allocation5] sm:$0xf]  ;;  %v65_v1 = vld [vmem:[#allocation2] sm:$0xff] }
   0xe   :  { %v255_v2 = vld [vmem:[#allocation7 + $0x38] sm:$0xff]  ;;  %v78_v3 = vsel %vm76_vm0, %v67_v0, 0  ;;  %v66_v4 = vpack.c.bf16 %v65_v1, %v65_v1  ;;  %vm72_vm1 = vcmask 64512   ;;  %v254_v5 = vld [vmem:[#allocation7 + $0x30] sm:$0xff]  ;;  %v253_v6 = vld [vmem:[#allocation7 + $0x28] sm:$0xff] }
   0xf   :  { %87 = vmatpush.bf16.msra.mxu0 %v78_v3  ;;  %163 = vmatpush.bf16.msra.mxu1 %v255_v2  ;;  %v252_v7 = vld [vmem:[#allocation7 + $0x20] sm:$0xff]  ;;  %v251_v8 = vld [vmem:[#allocation7 + $0x18] sm:$0xff]  ;;  %v250_v9 = vld [vmem:[#allocation7 + $0x10] sm:$0xff] }
  0x10   :  { %v249_v10 = vld [vmem:[#allocation7 + $0x8] sm:$0xff]  ;;  %v248_v11 = vld [vmem:[#allocation7] sm:$0xff]  ;;  %v262_v12 = vld [vmem:[%s426_s2] ss:$0 sm:$0xff]  ;;  %s375_s2 = smov [#allocation8]  }
  0x11   :  { %v263_v18 = vld [vmem:[%s428_s4] ss:$0 sm:$0xff]  ;;  %s201_s11 = sshll.u32 %s375_s2, 4  ;;  %s203_s4 = sshll.u32 %s429_s5, 4  ;;  %s202_s11 = int_to_ptr.vmem [resolvable:$true] %s201_s11  ;;  %s204_s4 = int_to_ptr.hbm [resolvable:$true] %s203_s4 }
  0x12   :  { %214 = vmatmul.msk.bf16.vlgmr.msra.gmra.mxu0 %vm72_vm1, %v66_v4 }
  0x13   :  { %164 = vmatpush.bf16.msra.mxu1 %v254_v5 }
  0x17   :  { %165 = vmatpush.bf16.msra.mxu1 %v253_v6 }
  0x1b   :  { %166 = vmatpush.bf16.msra.mxu1 %v252_v7 }
  0x1f   :  { %167 = vmatpush.bf16.msra.mxu1 %v251_v8 }
  0x23   :  { %168 = vmatpush.bf16.msra.mxu1 %v250_v9 }
  0x27   :  { %169 = vmatpush.bf16.msra.mxu1 %v249_v10 }
  0x2b   :  { %170 = vmatpush.bf16.msra.mxu1 %v248_v11 }
  0x8f   :  { %v89_v13 = vpop.f32.mrf.mxu0 }
  0x90   :  { %v90_v14 = vadd.f32 %v262_v12, %v89_v13 }
  0x92   :  { %v93_v15 = vmax.f32 %v90_v14, 0.0 }
  0x94   :  { %v94_v16 = vpack.c.bf16 %v93_v15, %v93_v15 }
  0x96   :  { %171 = vmatmul.bf16.vlgmr.msra.gmra.mxu1 %v94_v16 }
  0x97   :  { %v91_v17 = vpop.f32.mrf.mxu0 }
 0x113   :  { %v172_v19 = vpop.f32.mrf.mxu1 }
 0x114   :  { %v173_v20 = vadd.f32 %v263_v18, %v172_v19 }
 0x116   :  { %v247_v21 = vmul.f32 -1.442695, %v173_v20 }
 0x118   :  { %264 = vpow2.f32 %v247_v21 }
 0x11b   :  { %v174_v22 = vpop.f32.mrf.mxu1 }
 0x11e   :  { %v265_v23 = vpop.eup %264 }
 0x11f   :  { %v179_v24 = vadd.f32 1.0, %v265_v23 }
 0x121   :  { %266 = vrcp.f32 %v179_v24  ;;  %v191_v28 = vand.u32 2147483648, %v179_v24  ;;  %v189_v30 = vand.u32 2147483647, %v179_v24  ;;  %vm185_vm3 = vweird.f32 %v179_v24 }
 0x123   :  { %v192_v32 = vor.u32 1.1754944e-38, %v191_v28  ;;  %vm190_vm5 = vcmp.eq.f32.partialorder %v189_v30, 8.507059e+37 }
 0x127   :  { %v267_v25 = vpop.eup %266 }
 0x128   :  { %v181_v26 = vmul.f32 %v267_v25, %v179_v24  ;;  %vm186_vm2 = vweird.f32 %v267_v25 }
 0x129   :  { %vm187_vm4 = vmor %vm185_vm3, %vm186_vm2 }
 0x12a   :  { %v182_v27 = vsub.f32 1.0, %v181_v26 }
 0x12c   :  { %v183_v29 = vmul.f32 %v267_v25, %v182_v27 }
 0x12e   :  { %v184_v31 = vadd.f32 %v267_v25, %v183_v29 }
 0x130   :  { %v188_v33 = vsel %vm187_vm4, %v267_v25, %v184_v31 }
 0x131   :  { %v193_v34 = vsel %vm190_vm5, %v192_v32, %v188_v33 }
 0x132   :  { %195 = vst [vmem:[#allocation8] sm:$0xff] %v193_v34 }
 0x133   :  { %206 = dma.vmem_to_hbm [thread:$0]  %s202_s11, 128, %s204_s4, [#allocation4]  }
 0x134   :  { %368 = dma.done.wait [#allocation4], 128  }
 0x135   :  { %369 = vsyncadd [#allocation4], 4294967168 }
 0x136   :  { %211 = vsyncpa [#allocation3], 1 }
 0x137   :  { %212 = vsyncpa [#allocation6], 1 }
 0x138   :  { %213 = vsyncpa [#allocation4], 1 }

</bundles_post_ra>
